<compile_context>
chip_gen: v7x
topology: tpu7x:2x2x1
jax: 0.10.0
libtpu: 0.0.40
codegen_flags: <defaults>
</compile_context>

<pallas_src>
import jax
import jax.numpy as jnp
from jax.experimental import pallas as pl
from jax.experimental.pallas import tpu as pltpu


def make_sinusoid_table(sequence_length: int, d_hid: int) -> jnp.ndarray:
    """Deterministic sinusoid position encoding table, shape (1, L, D), f32."""
    pos = jnp.arange(sequence_length, dtype=jnp.float32)[:, None]          # (L, 1)
    hid = jnp.arange(d_hid, dtype=jnp.int32)                                # (D,)
    # position / 10000 ** (2 * (hid_j // 2) / d_hid)
    exponent = (2.0 * (hid // 2).astype(jnp.float32)) / float(d_hid)        # (D,)
    denom = jnp.power(10000.0, exponent)[None, :]                           # (1, D)
    angles = pos / denom                                                    # (L, D)
    even_mask = (hid % 2 == 0)[None, :]                                     # (1, D)
    table = jnp.where(even_mask, jnp.sin(angles), jnp.cos(angles))          # (L, D)
    return table[None, :, :]                                                # (1, L, D)


def _pos_enc_kernel(x_ref, pos_ref, o_ref):
    # x_ref / o_ref: (bt, lt); pos_ref: (1, lt).
    # Pure VPU add; (1, lt) -> (bt, lt) is a cheap sublane broadcast.
    # DMA/HBM bound: no compute-side micro-opts needed.
    o_ref[...] = x_ref[...] + pos_ref[...]


# Per-block byte budget for one x/out tile.  Double-buffered x + out + the
# resident pos tile stays ~<= 30 MiB total: well under v7x's 64 MiB physical
# VMEM and fine on v5e/v6e (128 MiB) with the explicit vmem_limit below.
_TARGET_BLOCK_BYTES = 4 * 1024 * 1024
# Only bother splitting a single-block grid (for v7x's 2 TensorCores) when the
# block is big enough for the split to matter.
_MEGACORE_SPLIT_BYTES = 512 * 1024


def _sublane_quantum(dtype) -> int:
    """Native sublane count per vreg tile for this dtype (8 f32 / 16 bf16 / 32 i8)."""
    return {4: 8, 2: 16, 1: 32}.get(jnp.dtype(dtype).itemsize, 8)


def prepare_pos_table(pos_table: jnp.ndarray, seq_len: int, dtype) -> jnp.ndarray:
    """Slice/cast/flatten the (1, L, D) table to a lane-dense (1, seq_len*D) row.

    Hoist this to model init; it is pure glue and should not run per call.
    """
    d_hid = pos_table.shape[-1]
    return (pos_table.reshape(-1, d_hid)[:seq_len, :]
            .astype(dtype)
            .reshape(1, seq_len * d_hid))


def positional_encoding(x: jnp.ndarray, pos_table: jnp.ndarray,
                        *, donate_x: bool = False) -> jnp.ndarray:
    """x: (B, S, D).  pos_table: either the raw (1, L, D) table (L >= S) or a
    pre-prepared (1, S*D) row from prepare_pos_table().  Returns x + pos."""
    B, S, D = x.shape
    L = S * D
    itemsize = jnp.dtype(x.dtype).itemsize
    sub_q = _sublane_quantum(x.dtype)

    if pos_table.ndim == 3:
        pos = prepare_pos_table(pos_table, S, x.dtype)       # convenience path
    else:
        assert pos_table.shape == (1, L), "prepared pos table has wrong shape"
        pos = pos_table.astype(x.dtype)

    x2 = x.reshape(B, L)                                      # lane-dense slab

    # ---- Tile selection (sublane floor folded into the lane-tile budget) ----
    # Lane tile: multiple of 128 (or the full row).  Budgeted assuming a block
    # of sub_q sublanes, so the later bt choice cannot exceed the byte target.
    lane_budget = max(128, (_TARGET_BLOCK_BYTES // (sub_q * itemsize)) // 128 * 128)
    lt = L if L <= lane_budget else lane_budget

    # Sublane tile: multiple of sub_q (or the full batch), from what the lane
    # tile leaves of the budget.
    bt_budget = max(sub_q, (_TARGET_BLOCK_BYTES // (lt * itemsize)) // sub_q * sub_q)
    bt = B if B <= bt_budget else bt_budget

    # v7x megacore: a mid-sized problem that fits in one block would leave one
    # TensorCore idle — split one axis so the grid has >= 2 parallel programs.
    if (pl.cdiv(L, lt) * pl.cdiv(B, bt) < 2
            and bt * lt * itemsize >= _MEGACORE_SPLIT_BYTES):
        if bt >= 2 * sub_q:
            bt = pl.cdiv(pl.cdiv(B, 2), sub_q) * sub_q
        elif lt >= 2 * 128:
            lt = pl.cdiv(pl.cdiv(L, 2), 128) * 128

    # Grid ordering: lane tiles outer, batch tiles inner -> the pos block index
    # is constant along the inner axis and stays resident in VMEM.
    grid = (pl.cdiv(L, lt), pl.cdiv(B, bt))

    # Explicit VMEM budget from the chosen tiles: double-buffered x + out + pos
    # (pos's single row pads to sub_q sublanes in VMEM), plus ~25% headroom.
    block_bytes = bt * lt * itemsize
    pos_bytes = sub_q * lt * itemsize
    vmem_limit = int((2 * block_bytes + 2 * block_bytes + 2 * pos_bytes) * 1.25)
    vmem_limit = min(max(vmem_limit + (1 << 20), 4 << 20), 60 << 20)

    extra = {}
    if donate_x:
        # Caller does not need x afterwards: reuse its HBM buffer for the output.
        extra["input_output_aliases"] = {0: 0}

    out2 = pl.pallas_call(
        _pos_enc_kernel,
        out_shape=jax.ShapeDtypeStruct((B, L), x.dtype),
        grid_spec=pltpu.PrefetchScalarGridSpec(
            num_scalar_prefetch=0,
            grid=grid,
            in_specs=[
                pl.BlockSpec((bt, lt), lambda l, b: (b, l)),   # x slab
                pl.BlockSpec((1, lt), lambda l, b: (0, l)),    # pos (resident over b)
            ],
            out_specs=pl.BlockSpec((bt, lt), lambda l, b: (b, l)),
        ),
        compiler_params=pltpu.CompilerParams(
            dimension_semantics=("parallel", "parallel"),
            vmem_limit_bytes=vmem_limit,
        ),
        **extra,
    )(x2, pos)

    return out2.reshape(B, S, D)


if __name__ == "__main__":
    # Small shapes consistent with the module: batch=2, seq=8, hidden=32,
    # table sequence_length = 16 >= seq.
    B, S, D = 2, 8, 32
    sequence_length = 16

    key = jax.random.PRNGKey(0)
    x = jax.random.normal(key, (B, S, D), dtype=jnp.float32)

    pos_table = make_sinusoid_table(sequence_length, D)          # (1, 16, 32) f32

    # Hoisted one-time preparation (model init), then the hot-path call.
    pos_flat = prepare_pos_table(pos_table, S, x.dtype)          # (1, S*D)

    out = positional_encoding(x, pos_flat)
    out = jax.block_until_ready(out)

    # Reference check in plain JAX (same math as the PyTorch forward).
    ref = x + pos_table[:, :S, :]
    assert out.shape == (B, S, D)
    assert jnp.allclose(out, ref, atol=1e-6), "mismatch vs reference"

    # Also exercise the convenience path that takes the raw (1, L, D) table.
    out2 = jax.block_until_ready(positional_encoding(x, pos_table))
    assert jnp.allclose(out2, ref, atol=1e-6), "mismatch vs reference (raw table)"

    print("KERNEL_OK")
</pallas_src>

<mosaic_0001>
module attributes {stable_mosaic.version = 11 : i64} {
  func.func @_pos_enc_kernel(%arg0: i32, %arg1: i32, %arg2: memref<2x256xf32, #tpu.memory_space<vmem>>, %arg3: memref<1x256xf32, #tpu.memory_space<vmem>>, %arg4: memref<2x256xf32, #tpu.memory_space<vmem>>) attributes {dimension_semantics = [#tpu.dimension_semantics<parallel>, #tpu.dimension_semantics<parallel>], iteration_bounds = array<i64: 1, 1>, scalar_prefetch = 0 : i64, scratch_operands = 0 : i64, tpu.core_type = #tpu.core_type<tc>, window_params = [{transform_indices = @transform_0, window_bounds = array<i64: 2, 256>}, {transform_indices = @transform_1, window_bounds = array<i64: 1, 256>}, {transform_indices = @transform_2, window_bounds = array<i64: 2, 256>}]} {
    %c0 = arith.constant 0 : index
    %c0_0 = arith.constant 0 : index
    %0 = vector.load %arg2[%c0, %c0_0] : memref<2x256xf32, #tpu.memory_space<vmem>>, vector<2x256xf32>
    %c0_1 = arith.constant 0 : index
    %c0_2 = arith.constant 0 : index
    %1 = vector.load %arg3[%c0_1, %c0_2] : memref<1x256xf32, #tpu.memory_space<vmem>>, vector<1x256xf32>
    %2 = vector.broadcast %1 : vector<1x256xf32> to vector<2x256xf32>
    %3 = arith.addf %0, %2 : vector<2x256xf32>
    %c0_3 = arith.constant 0 : index
    %c0_4 = arith.constant 0 : index
    %4 = vector.load %arg4[%c0_3, %c0_4] : memref<2x256xf32, #tpu.memory_space<vmem>>, vector<2x256xf32>
    tpu.vector_store %arg4[%c0_3, %c0_4], %3 {strides = array<i32>} : memref<2x256xf32, #tpu.memory_space<vmem>>, vector<2x256xf32>,
    return
  }
  func.func @transform_0(%arg0: i32, %arg1: i32) -> (i32, i32) {
    %c0_i32 = arith.constant 0 : i32
    return %arg1, %arg0 : i32, i32
  }
  func.func @transform_1(%arg0: i32, %arg1: i32) -> (i32, i32) {
    %c0_i32 = arith.constant 0 : i32
    %c0_i32_0 = arith.constant 0 : i32
    return %c0_i32, %arg0 : i32, i32
  }
  func.func @transform_2(%arg0: i32, %arg1: i32) -> (i32, i32) {
    %c0_i32 = arith.constant 0 : i32
    return %arg1, %arg0 : i32, i32
  }
}

</mosaic_0001>

<bundles_post_ra>
// kernel: tpu_custom_call.1
= control target key start
LH: loop header
LB: loop body
LE: loop exit
PB: predicated region body
PF: predicated region fallthrough
CT: control target
= control target key end

     0   :  { %7 = vsyncpa [#allocation3], 0  ;;  %s157_s0 = inlined_call_operand.hbm [shape: f32[2,256], index: 0, kind: input, shape index: {}]   ;;  %s158_s1 = inlined_call_operand.vmem [shape: f32[1,256], index: 1, kind: input, shape index: {}]   ;;  %s159_s2 = inlined_call_operand.hbm [shape: f32[2,256], index: 2, kind: output, shape index: {}]  }
   0x1   :  { %8 = vsyncpa [#allocation4], 0  ;;  %s112_s9 = smov [#allocation2]   ;;  %s64_s13 = scalar_lea.hbm %s157_s0, 64 }
   0x2   :  { %s15_s10 = sshll.u32 %s112_s9, 4  ;;  %p65_p0 = scmp.ne.s32.totalorder %s157_s0, %s64_s13  ;;  %s16_s10 = int_to_ptr.vmem [resolvable:$true] %s15_s10 }
   0x3   :  { %p68_p1 = scmp.lt.u32.totalorder %s64_s13, %s157_s0 }
   0x5   :  { %p70_p2 = pnand %p68_p1, %p65_p0 }
   0x7   :  { %73 = shalt.err (!%p70_p2)
}
   0x8   :  { %s74_s18 = scalar_lea.vmem %s16_s10, 64  ;;  %p79_p4 = scmp.lt.s32.totalorder %s16_s10, %s16_s10 }
   0x9   :  { %p75_p3 = scmp.ne.s32.totalorder %s16_s10, %s74_s18  ;;  %p80_p5 = scmp.lt.s32.totalorder %s74_s18, %s74_s18 }
   0xb   :  { %p81_p6 = por %p80_p5, %p79_p4 }
   0xd   :  { %p82_p7 = pnand %p81_p6, %p75_p3 }
   0xf   :  { %85 = shalt.err (!%p82_p7)
}
  0x10   :  { %18 = dma.hbm_to_vmem [thread:$0]  %s157_s0, 64, %s16_s10, [#allocation3]  }
  0x11   :  { %108 = dma.done.wait [#allocation3], 64  }
  0x12   :  { %109 = vsyncadd [#allocation3], 4294967232  ;;  %v27_v0 = vlaneseq  ;;  %v113_v1 = vmov 1983009808   ;;  %v25_v7 = vld [vmem:[%s158_s1] sm:$0x3] }
  0x13   :  { %v37_v2 = vunpack.c.l.s4 %v113_v1  ;;  %v24_v12 = vld [vmem:[#allocation2] sm:$0xf]  ;;  %s114_s23 = smov [#allocation5]  }
  0x14   :  { %v28_v3 = vshrl.u32 %v27_v0, 7  ;;  %s52_s0 = sshll.u32 %s114_s23, 4  ;;  %s53_s0 = int_to_ptr.vmem [resolvable:$true] %s52_s0 }
  0x15   :  { %v38_v6 = vunpack.c.0.s8 %v37_v2  ;;  %s86_s24 = scalar_lea.vmem %s53_s0, 64  ;;  %p91_p9 = scmp.lt.s32.totalorder %s53_s0, %s53_s0 }
  0x16   :  { %v29_v4 = vsub.s32 0, %v28_v3  ;;  %v33_v5 = vsub.s32 1, %v28_v3  ;;  %p87_p8 = scmp.ne.s32.totalorder %s53_s0, %s86_s24  ;;  %p92_p10 = scmp.lt.s32.totalorder %s86_s24, %s86_s24 }
  0x17   :  { %v41_v10 = vsub.s32 %v38_v6, %v28_v3 }
  0x18   :  { %v30_v8 = vrot.slane %v25_v7, %v29_v4  ;;  %v34_v9 = vrot.slane %v25_v7, %v33_v5  ;;  %p93_p11 = por %p92_p10, %p91_p9 }
  0x1a   :  { %v35_v11 = vcombine.low %v30_v8, %v34_v9  ;;  %p94_p12 = pnand %p93_p11, %p87_p8 }
  0x1c   :  { %v42_v13 = vrot.slane %v35_v11, %v41_v10 }
  0x1e   :  { %v44_v14 = vadd.f32 %v42_v13, %v24_v12 }
  0x20   :  { %45 = vst [vmem:[#allocation5] sm:$0xf] %v44_v14 }
  0x21   :  { %97 = shalt.err (!%p94_p12)
}
  0x22   :  { %s98_s26 = scalar_lea.hbm %s159_s2, 64 }
  0x23   :  { %p99_p13 = scmp.ne.s32.totalorder %s159_s2, %s98_s26  ;;  %p102_p0 = scmp.lt.u32.totalorder %s98_s26, %s159_s2 }
  0x25   :  { %p104_p1 = pnand %p102_p0, %p99_p13 }
  0x27   :  { %107 = shalt.err (!%p104_p1)
}
  0x28   :  { %55 = dma.vmem_to_hbm [thread:$0]  %s53_s0, 64, %s159_s2, [#allocation4]  }
  0x29   :  { %110 = dma.done.wait [#allocation4], 64  }
  0x2a   :  { %111 = vsyncadd [#allocation4], 4294967232 }
  0x2b   :  { %59 = vsyncpa [#allocation3], 1 }
  0x2c   :  { %60 = vsyncpa [#allocation4], 1 }

</bundles_post_ra>
